<compile_context>
chip_gen: v7x
topology: tpu7x:2x2x1
jax: 0.10.0
libtpu: 0.0.40
codegen_flags: <defaults>
</compile_context>

<pallas_src>
import jax
import jax.numpy as jnp
from jax.experimental import pallas as pl
from jax.experimental.pallas import tpu as pltpu

NUM_STATE = 3   # Pendulum-v0 observation dim
H1 = 64
H2 = 8
N_HEADS = 2     # mu and sigma, fused

_TILE_B_MAX = 8192   # lanes (batch rows) per tile
_LANE = 128


def _leaky_relu(x, slope=0.01):
    # mul + max (2 VALU ops); identical to leaky_relu for slope in (0, 1).
    return jnp.maximum(x, slope * x)


def _round_up(n, m):
    return ((n + m - 1) // m) * m


def actor_kernel(x_ref, w1_ref, b1_ref, w2_ref, b2_ref, wh_ref, bh_ref, out_ref):
    x = x_ref[...]                                     # (3, TB), batch on lanes

    # fc1: (64, 3) @ (3, TB) on the MXU.
    h1 = jnp.dot(w1_ref[...], x, preferred_element_type=jnp.float32) + b1_ref[...]
    h1 = _leaky_relu(h1)                               # (64, TB)

    # fc2: (8, 64) @ (64, TB) on the MXU.
    h2 = jnp.dot(w2_ref[...], h1, preferred_element_type=jnp.float32) + b2_ref[...]
    h2 = _leaky_relu(h2)                               # (8, TB)

    # Fused mu/sigma head: (2, 8) @ (8, TB) on the MXU.
    head = jnp.dot(wh_ref[...], h2, preferred_element_type=jnp.float32) + bh_ref[...]

    out_ref[...] = head.astype(out_ref.dtype)          # (2, TB), lane-dense store


def actor_forward(x, params, tile_b_max=_TILE_B_MAX):
    """x: (B, 3) f32 -> (mu, sigma), each (B, 1) f32."""
    B = x.shape[0]
    Bc = max(B, 1)

    # Tile selection: minimize padding, keep tiles lane-aligned (multiple of 128),
    # and (when the batch is big enough) give the grid >= 2 steps so the
    # "parallel" axis can be split across v7x's two TensorCores.
    n_tiles = pl.cdiv(Bc, tile_b_max)
    if n_tiles == 1 and Bc > 2 * _LANE:
        n_tiles = 2
    tb = _round_up(pl.cdiv(Bc, n_tiles), _LANE)
    Bp = n_tiles * tb

    xp = jnp.pad(x, ((0, Bp - B), (0, 0))) if Bp != B else x
    xt = xp.T                                          # (3, Bp)

    resident = lambda i: (0, 0)   # weights/biases stay VMEM-resident across steps

    out = pl.pallas_call(
        actor_kernel,
        out_shape=jax.ShapeDtypeStruct((N_HEADS, Bp), jnp.float32),
        grid=(n_tiles,),
        in_specs=[
            pl.BlockSpec((NUM_STATE, tb), lambda i: (0, i)),   # x^T (batch-tiled on lanes)
            pl.BlockSpec((H1, NUM_STATE), resident),           # w1^T  (64, 3)
            pl.BlockSpec((H1, 1), resident),                   # b1    (64, 1)
            pl.BlockSpec((H2, H1), resident),                  # w2^T  (8, 64)
            pl.BlockSpec((H2, 1), resident),                   # b2    (8, 1)
            pl.BlockSpec((N_HEADS, H2), resident),             # fused head weight (2, 8)
            pl.BlockSpec((N_HEADS, 1), resident),              # fused head bias   (2, 1)
        ],
        out_specs=pl.BlockSpec((N_HEADS, tb), lambda i: (0, i)),
        compiler_params=pltpu.CompilerParams(
            dimension_semantics=("parallel",)),
    )(xt, params["w1"], params["b1"], params["w2"], params["b2"],
      params["wh"], params["bh"])

    mu = out[0, :B].reshape(B, 1)
    sigma = out[1, :B].reshape(B, 1)
    return mu, sigma


def init_params(key):
    # Deterministic init mimicking PyTorch nn.Linear default:
    # U(-1/sqrt(fan_in), 1/sqrt(fan_in)) for both weight and bias.
    # Weights are stored already transposed ((out, in)) for the lane-dense layout.
    def linear(key, fan_in, fan_out):
        kw, kb = jax.random.split(key)
        bound = 1.0 / jnp.sqrt(jnp.float32(fan_in))
        w = jax.random.uniform(kw, (fan_out, fan_in), jnp.float32, -bound, bound)
        b = jax.random.uniform(kb, (fan_out, 1), jnp.float32, -bound, bound)
        return w, b

    k1, k2, k3, k4 = jax.random.split(key, 4)
    w1, b1 = linear(k1, NUM_STATE, H1)     # (64, 3), (64, 1)
    w2, b2 = linear(k2, H1, H2)            # (8, 64), (8, 1)
    wmu, bmu = linear(k3, H2, 1)           # (1, 8),  (1, 1)
    wsg, bsg = linear(k4, H2, 1)
    # Fuse the two heads into a single (2, 8) weight / (2, 1) bias.
    wh = jnp.concatenate([wmu, wsg], axis=0)
    bh = jnp.concatenate([bmu, bsg], axis=0)
    return dict(w1=w1, b1=b1, w2=w2, b2=b2, wh=wh, bh=bh)


def actor_ref(x, p):
    # Pure-JAX reference (feature-last math) for correctness check.
    h1 = jnp.maximum(x @ p["w1"].T + p["b1"].T, 0.01 * (x @ p["w1"].T + p["b1"].T))
    h2_pre = h1 @ p["w2"].T + p["b2"].T
    h2 = jnp.maximum(h2_pre, 0.01 * h2_pre)
    head = h2 @ p["wh"].T + p["bh"].T
    return head[:, 0:1], head[:, 1:2]


if __name__ == "__main__":
    key = jax.random.PRNGKey(0)
    kx1, kx2, kx3, kp = jax.random.split(key, 4)
    params = init_params(kp)

    # Small batch (single tile, lane-padded).
    B = 8
    x = jax.random.normal(kx1, (B, NUM_STATE), jnp.float32)
    mu, sigma = actor_forward(x, params)
    jax.block_until_ready((mu, sigma))
    mu_r, sg_r = actor_ref(x, params)
    assert mu.shape == (B, 1) and sigma.shape == (B, 1)
    assert jnp.allclose(mu, mu_r, atol=1e-5, rtol=1e-5)
    assert jnp.allclose(sigma, sg_r, atol=1e-5, rtol=1e-5)

    # Batch that is not a multiple of 128 (exercises padding path).
    B2 = 37
    x2 = jax.random.normal(kx2, (B2, NUM_STATE), jnp.float32)
    mu2, sigma2 = actor_forward(x2, params)
    jax.block_until_ready((mu2, sigma2))
    mu2_r, sg2_r = actor_ref(x2, params)
    assert mu2.shape == (B2, 1) and sigma2.shape == (B2, 1)
    assert jnp.allclose(mu2, mu2_r, atol=1e-5, rtol=1e-5)
    assert jnp.allclose(sigma2, sg2_r, atol=1e-5, rtol=1e-5)

    # Batch large enough to get a multi-step grid (two TC split on v7x).
    B3 = 300
    x3 = jax.random.normal(kx3, (B3, NUM_STATE), jnp.float32)
    mu3, sigma3 = actor_forward(x3, params)
    jax.block_until_ready((mu3, sigma3))
    mu3_r, sg3_r = actor_ref(x3, params)
    assert mu3.shape == (B3, 1) and sigma3.shape == (B3, 1)
    assert jnp.allclose(mu3, mu3_r, atol=1e-5, rtol=1e-5)
    assert jnp.allclose(sigma3, sg3_r, atol=1e-5, rtol=1e-5)

    print("KERNEL_OK")
</pallas_src>

<mosaic_0001>
module attributes {stable_mosaic.version = 11 : i64} {
  func.func @actor_kernel(%arg0: i32, %arg1: memref<3x128xf32, #tpu.memory_space<vmem>>, %arg2: memref<64x3xf32, #tpu.memory_space<vmem>>, %arg3: memref<64x1xf32, #tpu.memory_space<vmem>>, %arg4: memref<8x64xf32, #tpu.memory_space<vmem>>, %arg5: memref<8x1xf32, #tpu.memory_space<vmem>>, %arg6: memref<2x8xf32, #tpu.memory_space<vmem>>, %arg7: memref<2x1xf32, #tpu.memory_space<vmem>>, %arg8: memref<2x128xf32, #tpu.memory_space<vmem>>) attributes {dimension_semantics = [#tpu.dimension_semantics<parallel>], iteration_bounds = array<i64: 1>, scalar_prefetch = 0 : i64, scratch_operands = 0 : i64, tpu.core_type = #tpu.core_type<tc>, window_params = [{transform_indices = @transform_0, window_bounds = array<i64: 3, 128>}, {pipeline_mode = #tpu.pipeline_mode<synchronous>, transform_indices = @transform_1, window_bounds = array<i64: 64, 3>}, {pipeline_mode = #tpu.pipeline_mode<synchronous>, transform_indices = @transform_2, window_bounds = array<i64: 64, 1>}, {pipeline_mode = #tpu.pipeline_mode<synchronous>, transform_indices = @transform_3, window_bounds = array<i64: 8, 64>}, {pipeline_mode = #tpu.pipeline_mode<synchronous>, transform_indices = @transform_4, window_bounds = array<i64: 8, 1>}, {pipeline_mode = #tpu.pipeline_mode<synchronous>, transform_indices = @transform_5, window_bounds = array<i64: 2, 8>}, {pipeline_mode = #tpu.pipeline_mode<synchronous>, transform_indices = @transform_6, window_bounds = array<i64: 2, 1>}, {transform_indices = @transform_7, window_bounds = array<i64: 2, 128>}]} {
    %c0 = arith.constant 0 : index
    %c0_0 = arith.constant 0 : index
    %0 = vector.load %arg1[%c0, %c0_0] : memref<3x128xf32, #tpu.memory_space<vmem>>, vector<3x128xf32>
    %c0_1 = arith.constant 0 : index
    %c0_2 = arith.constant 0 : index
    %1 = vector.load %arg2[%c0_1, %c0_2] : memref<64x3xf32, #tpu.memory_space<vmem>>, vector<64x3xf32>
    %cst = arith.constant dense<0.000000e+00> : vector<64x128xf32>
    %2 = tpu.matmul %1, %0, %cst {dimension_numbers = #tpu.dot_dimension_numbers<[1], [0], [0], [1], [0, 0, 1, 1], [], []>} : vector<64x3xf32>, vector<3x128xf32>, vector<64x128xf32> -> vector<64x128xf32>
    %c0_3 = arith.constant 0 : index
    %c0_4 = arith.constant 0 : index
    %3 = vector.load %arg3[%c0_3, %c0_4] : memref<64x1xf32, #tpu.memory_space<vmem>>, vector<64x1xf32>
    %4 = vector.broadcast %3 : vector<64x1xf32> to vector<64x128xf32>
    %5 = arith.addf %2, %4 : vector<64x128xf32>
    %cst_5 = arith.constant 0.00999999977 : f32
    %6 = vector.broadcast %cst_5 : f32 to vector<64x128xf32>
    %7 = arith.mulf %6, %5 : vector<64x128xf32>
    %8 = arith.maximumf %5, %7 : vector<64x128xf32>
    %c0_6 = arith.constant 0 : index
    %c0_7 = arith.constant 0 : index
    %9 = vector.load %arg4[%c0_6, %c0_7] : memref<8x64xf32, #tpu.memory_space<vmem>>, vector<8x64xf32>
    %cst_8 = arith.constant dense<0.000000e+00> : vector<8x128xf32>
    %10 = tpu.matmul %9, %8, %cst_8 {dimension_numbers = #tpu.dot_dimension_numbers<[1], [0], [0], [1], [0, 0, 1, 1], [], []>} : vector<8x64xf32>, vector<64x128xf32>, vector<8x128xf32> -> vector<8x128xf32>
    %c0_9 = arith.constant 0 : index
    %c0_10 = arith.constant 0 : index
    %11 = vector.load %arg5[%c0_9, %c0_10] : memref<8x1xf32, #tpu.memory_space<vmem>>, vector<8x1xf32>
    %12 = vector.broadcast %11 : vector<8x1xf32> to vector<8x128xf32>
    %13 = arith.addf %10, %12 : vector<8x128xf32>
    %cst_11 = arith.constant 0.00999999977 : f32
    %14 = vector.broadcast %cst_11 : f32 to vector<8x128xf32>
    %15 = arith.mulf %14, %13 : vector<8x128xf32>
    %16 = arith.maximumf %13, %15 : vector<8x128xf32>
    %c0_12 = arith.constant 0 : index
    %c0_13 = arith.constant 0 : index
    %17 = vector.load %arg6[%c0_12, %c0_13] : memref<2x8xf32, #tpu.memory_space<vmem>>, vector<2x8xf32>
    %cst_14 = arith.constant dense<0.000000e+00> : vector<2x128xf32>
    %18 = tpu.matmul %17, %16, %cst_14 {dimension_numbers = #tpu.dot_dimension_numbers<[1], [0], [0], [1], [0, 0, 1, 1], [], []>} : vector<2x8xf32>, vector<8x128xf32>, vector<2x128xf32> -> vector<2x128xf32>
    %c0_15 = arith.constant 0 : index
    %c0_16 = arith.constant 0 : index
    %19 = vector.load %arg7[%c0_15, %c0_16] : memref<2x1xf32, #tpu.memory_space<vmem>>, vector<2x1xf32>
    %20 = vector.broadcast %19 : vector<2x1xf32> to vector<2x128xf32>
    %21 = arith.addf %18, %20 : vector<2x128xf32>
    %c0_17 = arith.constant 0 : index
    %c0_18 = arith.constant 0 : index
    %22 = vector.load %arg8[%c0_17, %c0_18] : memref<2x128xf32, #tpu.memory_space<vmem>>, vector<2x128xf32>
    tpu.vector_store %arg8[%c0_17, %c0_18], %21 {strides = array<i32>} : memref<2x128xf32, #tpu.memory_space<vmem>>, vector<2x128xf32>,
    return
  }
  func.func @transform_0(%arg0: i32) -> (i32, i32) {
    %c0_i32 = arith.constant 0 : i32
    %c0_i32_0 = arith.constant 0 : i32
    return %c0_i32, %arg0 : i32, i32
  }
  func.func @transform_1(%arg0: i32) -> (i32, i32) {
    %c0_i32 = arith.constant 0 : i32
    %c0_i32_0 = arith.constant 0 : i32
    %c0_i32_1 = arith.constant 0 : i32
    return %c0_i32, %c0_i32_0 : i32, i32
  }
  func.func @transform_2(%arg0: i32) -> (i32, i32) {
    %c0_i32 = arith.constant 0 : i32
    %c0_i32_0 = arith.constant 0 : i32
    %c0_i32_1 = arith.constant 0 : i32
    return %c0_i32, %c0_i32_0 : i32, i32
  }
  func.func @transform_3(%arg0: i32) -> (i32, i32) {
    %c0_i32 = arith.constant 0 : i32
    %c0_i32_0 = arith.constant 0 : i32
    %c0_i32_1 = arith.constant 0 : i32
    return %c0_i32, %c0_i32_0 : i32, i32
  }
  func.func @transform_4(%arg0: i32) -> (i32, i32) {
    %c0_i32 = arith.constant 0 : i32
    %c0_i32_0 = arith.constant 0 : i32
    %c0_i32_1 = arith.constant 0 : i32
    return %c0_i32, %c0_i32_0 : i32, i32
  }
  func.func @transform_5(%arg0: i32) -> (i32, i32) {
    %c0_i32 = arith.constant 0 : i32
    %c0_i32_0 = arith.constant 0 : i32
    %c0_i32_1 = arith.constant 0 : i32
    return %c0_i32, %c0_i32_0 : i32, i32
  }
  func.func @transform_6(%arg0: i32) -> (i32, i32) {
    %c0_i32 = arith.constant 0 : i32
    %c0_i32_0 = arith.constant 0 : i32
    %c0_i32_1 = arith.constant 0 : i32
    return %c0_i32, %c0_i32_0 : i32, i32
  }
  func.func @transform_7(%arg0: i32) -> (i32, i32) {
    %c0_i32 = arith.constant 0 : i32
    %c0_i32_0 = arith.constant 0 : i32
    return %c0_i32, %arg0 : i32, i32
  }
}

</mosaic_0001>

<bundles_post_ra>
// kernel: tpu_custom_call.1
= control target key start
LH: loop header
LB: loop body
LE: loop exit
PB: predicated region body
PF: predicated region fallthrough
CT: control target
= control target key end

     0   :  { %vm109_vm0 = vcmask 1042432   ;;  %vm84_vm1 = vcmask 23552   ;;  %v525_v4 = vmov 0   ;;  %s653_s0 = inlined_call_operand.vmem [shape: f32[3,128], index: 0, kind: input, shape index: {}]   ;;  %s654_s1 = inlined_call_operand.vmem [shape: f32[64,3], index: 1, kind: input, shape index: {}]   ;;  %s655_s2 = inlined_call_operand.vmem [shape: f32[64,1], index: 2, kind: input, shape index: {}]   ;;  %s656_s3 = inlined_call_operand.vmem [shape: f32[8,64], index: 3, kind: input, shape index: {}]   ;;  %s657_s4 = inlined_call_operand.vmem [shape: f32[8,1], index: 4, kind: input, shape index: {}]   ;;  %s658_s5 = inlined_call_operand.vmem [shape: f32[2,8], index: 5, kind: input, shape index: {}]   ;;  %s659_s6 = inlined_call_operand.vmem [shape: f32[2,1], index: 6, kind: input, shape index: {}]   ;;  %s660_s7 = inlined_call_operand.hbm [shape: f32[2,128], index: 7, kind: output, shape index: {}]  }
   0x1   :  { %v27_v0 = vld [vmem:[%s653_s0] sm:$0x7]  ;;  %v29_v2 = vld [vmem:[%s654_s1 + $0x8] sm:$0xff]  ;;  %v30_v3 = vld [vmem:[%s654_s1 + $0x10] sm:$0xff]  ;;  %499 = vset.pattern.permute.xlu0 %v525_v4  ;;  %500 = vset.pattern.permute.xlu1 %v525_v4 }
   0x2   :  { %v28_v1 = vld [vmem:[%s654_s1] sm:$0xff]  ;;  %444 = vmatprep.subr.msk.mxu0 %vm109_vm0, %v27_v0  ;;  %v38_v6 = vld [vmem:[%s655_s2 + $0x10] sm:$0xff]  ;;  %v31_v7 = vld [vmem:[%s654_s1 + $0x18] sm:$0xff] }
   0x3   :  { %446 = vmatprep.mubr.msk.f32.mxu0 %vm84_vm1, %v28_v1  ;;  %445 = vmatpush3.msk.msra.mxu0 %vm109_vm0, %v27_v0  ;;  %v36_v5 = vld [vmem:[%s655_s2] sm:$0xff]  ;;  %v37_v9 = vld [vmem:[%s655_s2 + $0x8] sm:$0xff]  ;;  %v39_v10 = vld [vmem:[%s655_s2 + $0x18] sm:$0xff] }
   0x4   :  { %447 = vmatmul.mubr.msk.f32.vlgmr.msra.gmra.mrb[0].mxu0 %vm84_vm1, %v29_v2  ;;  %46 = vperm.xlu0 %499, %v36_v5   ;;  %v32_v8 = vld [vmem:[%s654_s1 + $0x20] sm:$0xff] }
   0x5   :  { %449 = vmatprep.mubr.msk.f32.mxu0 %vm84_vm1, %v30_v3  ;;  %56 = vperm.xlu1 %500, %v38_v6  }
   0x6   :  { %12 = vsyncpa [#allocation3], 0  ;;  %v33_v11 = vld [vmem:[%s654_s1 + $0x28] sm:$0xff]  ;;  %v34_v12 = vld [vmem:[%s654_s1 + $0x30] sm:$0xff]  ;;  %v526_v20 = vmov 0.0|0.0   ;;  %vm527_vm2 = vmmov 0  }
   0x7   :  { %v40_v13 = vld [vmem:[%s655_s2 + $0x20] sm:$0xff]  ;;  %v41_v14 = vld [vmem:[%s655_s2 + $0x28] sm:$0xff]  ;;  %v35_v15 = vld [vmem:[%s654_s1 + $0x38] sm:$0xff]  ;;  %482 = vmatprep.subr.bf16.mxu1 %v526_v20  ;;  %v528_v21 = vmov 0.0   ;;  %vm241_vm3 = vcmask 523264   ;;  %vm324_vm4 = vcmask 64512  }
   0x8   :  { %450 = vmatmul.mubr.msk.f32.gmra.mrb[2].mxu0 %vm84_vm1, %v31_v7  ;;  %51 = vperm.xlu0 %499, %v37_v9   ;;  %v42_v16 = vld [vmem:[%s655_s2 + $0x30] sm:$0xff]  ;;  %v43_v17 = vld [vmem:[%s655_s2 + $0x38] sm:$0xff]  ;;  %v235_v18 = vld [vmem:[%s657_s4] sm:$0xff]  ;;  %s529_s14 = smov [#allocation2]  }
   0x9   :  { %452 = vmatprep.mubr.msk.f32.mxu0 %vm84_vm1, %v32_v8  ;;  %61 = vperm.xlu1 %500, %v39_v10   ;;  %v318_v19 = vld [vmem:[%s659_s6] sm:$0x3]  ;;  %s405_s15 = sshll.u32 %s529_s14, 4  ;;  %s406_s15 = int_to_ptr.vmem [resolvable:$true] %s405_s15 }
   0xa   :  { %474 = vmatprep.mubr.msk.f32.mxu1 %vm527_vm2, %v528_v21  ;;  %477 = vmatprep.subr.mxu0 %v528_v21  ;;  %v234_v2 = vld [vmem:[%s656_s3] sm:$0xff]  ;;  %s501_s3 = scalar_lea.vmem %s406_s15, 32  ;;  %p506_p1 = scmp.lt.s32.totalorder %s406_s15, %s406_s15 }
   0xb   :  { %v317_v9 = vld [vmem:[%s658_s5] sm:$0x3]  ;;  %p502_p0 = scmp.ne.s32.totalorder %s406_s15, %s501_s3  ;;  %p507_p2 = scmp.lt.s32.totalorder %s501_s3, %s501_s3 }
   0xc   :  { %453 = vmatmul.mubr.msk.f32.gmra.mrb[4].mxu0 %vm84_vm1, %v33_v11  ;;  %66 = vperm.xlu0 %499, %v40_v13  }
   0xd   :  { %455 = vmatprep.mubr.msk.f32.mxu0 %vm84_vm1, %v34_v12  ;;  %71 = vperm.xlu1 %500, %v41_v14   ;;  %p508_p3 = por %p507_p2, %p506_p1 }
   0xf   :  { %p509_p4 = pnand %p508_p3, %p502_p0 }
  0x10   :  { %456 = vmatmul.mubr.msk.f32.gmra.mrb[6].mxu0 %vm84_vm1, %v35_v15  ;;  %76 = vperm.xlu0 %499, %v42_v16  }
  0x11   :  { %81 = vperm.xlu1 %500, %v43_v17   ;;  %479 = vmatprep.mubr.msk.f32.mxu0 %vm527_vm2, %v528_v21 }
  0x14   :  { %238 = vperm.xlu0 %499, %v235_v18  }
  0x15   :  { %321 = vperm.xlu1 %500, %v318_v19  }
  0x83   :  { %v47_v22 = vpop.permute.xlu0 %46 }
  0x84   :  { %v57_v23 = vpop.permute.xlu1 %56 }
  0x87   :  { %v52_v24 = vpop.permute.xlu0 %51 }
  0x88   :  { %v62_v25 = vpop.permute.xlu1 %61 }
  0x8b   :  { %v67_v39 = vpop.permute.xlu0 %66 }
  0x8c   :  { %v72_v36 = vpop.permute.xlu1 %71 }
  0x8f   :  { %v77_v54 = vpop.permute.xlu0 %76 }
  0x90   :  { %v82_v50 = vpop.permute.xlu1 %81 }
  0x93   :  { %v239_v3 = vpop.permute.xlu0 %238 }
  0x94   :  { %v322_v10 = vpop.permute.xlu1 %321 }
  0xd7   :  { %v448_v26 = vpop.f32.mrb[0].mxu0 }
  0xd8   :  { %v185_v27 = vadd.f32 %v448_v26, %v52_v24  ;;  %v179_v28 = vpop.f32.mrb[1].mxu0 }
  0xd9   :  { %v180_v29 = vadd.f32 %v179_v28, %v47_v22 }
  0xda   :  { %v219_v30 = vmul.f32 0.01, %v185_v27 }
  0xdb   :  { %v218_v31 = vmul.f32 0.01, %v180_v29  ;;  %v451_v32 = vpop.f32.mrb[2].mxu0 }
  0xdc   :  { %v227_v33 = vmax.f32 %v185_v27, %v219_v30  ;;  %v195_v34 = vadd.f32 %v451_v32, %v62_v25  ;;  %v189_v35 = vpop.f32.mrb[3].mxu0 }
  0xdd   :  { %v226_v37 = vmax.f32 %v180_v29, %v218_v31  ;;  %v190_v38 = vadd.f32 %v189_v35, %v57_v23 }
  0xde   :  { %v221_v40 = vmul.f32 0.01, %v195_v34 }
  0xdf   :  { %v220_v41 = vmul.f32 0.01, %v190_v38  ;;  %v454_v42 = vpop.f32.mrb[4].mxu0  ;;  %v483_v43 = vpack.c.bf16 %v227_v33, %v226_v37 }
  0xe0   :  { %v229_v44 = vmax.f32 %v195_v34, %v221_v40  ;;  %v205_v45 = vadd.f32 %v454_v42, %v72_v36  ;;  %v199_v46 = vpop.f32.mrb[5].mxu0 }
  0xe1   :  { %v228_v47 = vmax.f32 %v190_v38, %v220_v41  ;;  %v200_v48 = vadd.f32 %v199_v46, %v67_v39  ;;  %484 = vmatpush3.bf16.msra.mxu1 %v483_v43 }
  0xe2   :  { %v223_v49 = vmul.f32 0.01, %v205_v45  ;;  %485 = vmatprep.subr.bf16.mxu1 %v526_v20 }
  0xe3   :  { %v222_v51 = vmul.f32 0.01, %v200_v48  ;;  %v457_v52 = vpop.f32.mrb[6].mxu0  ;;  %v486_v53 = vpack.c.bf16 %v229_v44, %v228_v47 }
  0xe4   :  { %v231_v55 = vmax.f32 %v205_v45, %v223_v49  ;;  %v215_v56 = vadd.f32 %v457_v52, %v82_v50  ;;  %v209_v57 = vpop.f32.mrb[7].mxu0 }
  0xe5   :  { %v230_v58 = vmax.f32 %v200_v48, %v222_v51  ;;  %v210_v59 = vadd.f32 %v209_v57, %v77_v54  ;;  %487 = vmatpush3.bf16.msra.mxu1 %v486_v53 }
  0xe6   :  { %v225_v60 = vmul.f32 0.01, %v215_v56  ;;  %488 = vmatprep.subr.bf16.mxu1 %v526_v20 }
  0xe7   :  { %v224_v61 = vmul.f32 0.01, %v210_v59  ;;  %v489_v62 = vpack.c.bf16 %v231_v55, %v230_v58 }
  0xe8   :  { %v233_v63 = vmax.f32 %v215_v56, %v225_v60 }
  0xe9   :  { %v232_v0 = vmax.f32 %v210_v59, %v224_v61  ;;  %490 = vmatpush3.bf16.msra.mxu1 %v489_v62 }
  0xea   :  { %491 = vmatprep.subr.bf16.mxu1 %v526_v20 }
  0xeb   :  { %v492_v1 = vpack.c.bf16 %v233_v63, %v232_v0 }
  0xed   :  { %493 = vmatpush3.bf16.msra.mxu1 %v492_v1 }
  0xf0   :  { %475 = vmatmul.mubr.msk.f32.vlgmr.msra.gmra.mrb[0].mxu1 %vm241_vm3, %v234_v2 }
 0x1c3   :  { %v311_v4 = vpop.f32.mrb[0].mxu1 }
 0x1c4   :  { %v312_v5 = vadd.f32 %v311_v4, %v239_v3  ;;  %v476_v6 = vpop.f32.mrb[1].mxu1 }
 0x1c6   :  { %v315_v7 = vmul.f32 0.01, %v312_v5 }
 0x1c8   :  { %v316_v8 = vmax.f32 %v312_v5, %v315_v7 }
 0x1ca   :  { %478 = vmatpush3.msra.mxu0 %v316_v8 }
 0x1cb   :  { %480 = vmatmul.mubr.msk.f32.vlgmr.msra.gmra.mrb[8].mxu0 %vm324_vm4, %v317_v9 }
 0x29e   :  { %v394_v11 = vpop.f32.mrb[8].mxu0 }
 0x29f   :  { %v395_v12 = vadd.f32 %v394_v11, %v322_v10  ;;  %v481_v13 = vpop.f32.mrb[9].mxu0 }
 0x2a1   :  { %398 = vst [vmem:[#allocation2] sm:$0x3] %v395_v12 }
 0x2a2   :  { %512 = shalt.err (!%p509_p4)
}
 0x2a3   :  { %s513_s17 = scalar_lea.hbm %s660_s7, 32 }
 0x2a4   :  { %p514_p5 = scmp.ne.s32.totalorder %s660_s7, %s513_s17  ;;  %p517_p6 = scmp.lt.u32.totalorder %s513_s17, %s660_s7 }
 0x2a6   :  { %p519_p7 = pnand %p517_p6, %p514_p5 }
 0x2a8   :  { %522 = shalt.err (!%p519_p7)
}
 0x2a9   :  { %408 = dma.vmem_to_hbm [thread:$0]  %s406_s15, 32, %s660_s7, [#allocation3]  }
 0x2aa   :  { %523 = dma.done.wait [#allocation3], 32  }
 0x2ab   :  { %524 = vsyncadd [#allocation3], 4294967264 }
 0x2ac   :  { %412 = vsyncpa [#allocation3], 1 }

</bundles_post_ra>
